<compile_context>
chip_gen: v6e
topology: v6e:2x2x1
jax: 0.10.0
libtpu: 0.0.40
codegen_flags: <defaults>
</compile_context>

<pallas_src>
import math

import jax
import jax.numpy as jnp
from jax.experimental import pallas as pl
from jax.experimental.pallas import tpu as pltpu

P_DROP = 0.1
_LANE = 128
_SUBLANE = 8
_VMEM_BUDGET = 44 * 1024 * 1024  # conservative; fits v7x's 64 MiB/TC physical VMEM


def _round_up(a, m):
    return (a + m - 1) // m * m


def _hash_u32(v):
    # lowbias32-style integer finalizer (pure VPU ops; works on TPU and interpreter).
    v = v ^ (v >> 16)
    v = v * jnp.uint32(0x7FEB352D)
    v = v ^ (v >> 15)
    v = v * jnp.uint32(0x846CA68B)
    v = v ^ (v >> 16)
    return v


def _dense_kernel(x_ref, w_ref, b_ref, o_ref):
    # Single dot over the full (resident) K: no accumulator, no phases.
    acc = jnp.dot(x_ref[...], w_ref[...], preferred_element_type=jnp.float32)
    o_ref[...] = (acc + b_ref[...]).astype(o_ref.dtype)


def _dense_dropout_kernel(seed_ref, x_ref, w_ref, b_ref, o_ref):
    acc = jnp.dot(x_ref[...], w_ref[...], preferred_element_type=jnp.float32)
    out = acc + b_ref[...]

    tm, npad = out.shape
    # Hoisted scalar tile offset + per-tile iota -> globally unique element index.
    base = pl.program_id(0) * (tm * npad)
    row = jax.lax.broadcasted_iota(jnp.int32, (tm, npad), 0)
    col = jax.lax.broadcasted_iota(jnp.int32, (tm, npad), 1)
    idx = (base + row * npad + col).astype(jnp.uint32)

    seed_u = seed_ref[0, 0].astype(jnp.uint32)
    h = _hash_u32(idx + seed_u * jnp.uint32(0x9E3779B1))
    keep = h >= jnp.uint32(429496730)  # round(P_DROP * 2**32)
    scale = jnp.float32(1.0 / (1.0 - P_DROP))
    out = jnp.where(keep, out * scale, jnp.float32(0.0))
    o_ref[...] = out.astype(o_ref.dtype)


def _pick_tm(M, Kp, Np, in_itemsize, out_itemsize):
    m8 = _round_up(max(M, 1), _SUBLANE)
    if m8 <= _SUBLANE:
        return m8
    # Aim for >= 2 M tiles (v7x megacore) while capping rows/tile at 512.
    tm = min(512, _round_up((m8 + 1) // 2, _SUBLANE))
    w_bytes = 2 * Kp * Np * in_itemsize  # (conservatively) double-buffered resident weight

    def fits(t):
        x_bytes = 2 * t * Kp * in_itemsize
        o_bytes = 2 * t * Np * out_itemsize
        return w_bytes + x_bytes + o_bytes + 2 * Np * 4 <= _VMEM_BUDGET

    while tm > _SUBLANE and not fits(tm):
        tm = _round_up(tm // 2, _SUBLANE)
    return tm


def vit_output_forward(x, w_t, b, *, training=False, seed=0, compute_dtype=jnp.bfloat16):
    """ViTOutput forward: dropout(x @ W^T + b, p=0.1).

    x:   (..., in_features)
    w_t: (in_features, out_features)   -- the nn.Linear weight, pre-transposed
    b:   (out_features,)
    """
    orig_shape = x.shape
    K = orig_shape[-1]
    N = w_t.shape[1]
    M = int(math.prod(orig_shape[:-1]))
    out_dtype = x.dtype

    if compute_dtype is not None:
        x = x.astype(compute_dtype)
        w_t = w_t.astype(compute_dtype)
    x2 = x.reshape(M, K)

    Kp = _round_up(K, _LANE)
    Np = _round_up(N, _LANE)  # lane-dense weight columns / output stores
    if Kp != K:               # standard ViT widths: no-op
        x2 = jnp.pad(x2, ((0, 0), (0, Kp - K)))
    # TODO(synk): pad + cast the static weight/bias once at module init, not per call.
    wp = jnp.pad(w_t, ((0, Kp - K), (0, Np - N))) if (Kp, Np) != (K, N) else w_t
    bp = (jnp.pad(b, (0, Np - N)) if Np != N else b).astype(jnp.float32).reshape(1, Np)

    in_itemsize = jnp.dtype(x2.dtype).itemsize
    out_itemsize = jnp.dtype(out_dtype).itemsize
    tm = _pick_tm(M, Kp, Np, in_itemsize, out_itemsize)
    grid = (pl.cdiv(M, tm),)  # M-only grid; full weight stays resident in VMEM

    x_spec = pl.BlockSpec((tm, Kp), lambda i: (i, 0))
    w_spec = pl.BlockSpec((Kp, Np), lambda i: (0, 0))  # constant block -> fetched once
    b_spec = pl.BlockSpec((1, Np), lambda i: (0, 0))
    o_spec = pl.BlockSpec((tm, Np), lambda i: (i, 0))
    out_shape = jax.ShapeDtypeStruct((M, Np), out_dtype)

    cost = pl.CostEstimate(
        flops=2 * M * K * N,
        bytes_accessed=(M * Kp + Kp * Np) * in_itemsize + M * Np * out_itemsize + Np * 4,
        transcendentals=0,
    )
    cparams = pltpu.CompilerParams(
        dimension_semantics=("parallel",),
        vmem_limit_bytes=64 * 1024 * 1024,
    )

    if training:
        seed_arr = jnp.asarray(seed, dtype=jnp.int32).reshape(1, 1)
        out = pl.pallas_call(
            _dense_dropout_kernel,
            out_shape=out_shape,
            grid=grid,
            in_specs=[pl.BlockSpec((1, 1), lambda i: (0, 0)), x_spec, w_spec, b_spec],
            out_specs=o_spec,
            compiler_params=cparams,
            cost_estimate=cost,
        )(seed_arr, x2, wp, bp)
    else:
        out = pl.pallas_call(
            _dense_kernel,
            out_shape=out_shape,
            grid=grid,
            in_specs=[x_spec, w_spec, b_spec],
            out_specs=o_spec,
            compiler_params=cparams,
            cost_estimate=cost,
        )(x2, wp, bp)

    if Np != N:
        out = out[:, :N]
    return out.reshape(orig_shape[:-1] + (N,))


if __name__ == "__main__":
    # Module config (small): hidden_d=32, mlp_ratio=4 -> in_features=128, out_features=32
    hidden_d, mlp_ratio = 32, 4
    in_features = hidden_d * mlp_ratio
    batch, seq = 2, 8

    key = jax.random.PRNGKey(0)
    kx, kw, kb = jax.random.split(key, 3)

    # Deterministic nn.Linear-style init: U(-1/sqrt(in), 1/sqrt(in))
    bound = 1.0 / math.sqrt(in_features)
    w = jax.random.uniform(kw, (hidden_d, in_features), jnp.float32, -bound, bound)  # (out, in)
    b = jax.random.uniform(kb, (hidden_d,), jnp.float32, -bound, bound)
    x = jax.random.normal(kx, (batch, seq, in_features), jnp.float32)
    w_t = w.T  # (in_features, out_features)

    # Pure-JAX references (f32 and bf16-operand variants).
    y_ref_f32 = x @ w.T + b
    y_ref_bf16 = (
        jnp.dot(
            x.astype(jnp.bfloat16).reshape(-1, in_features),
            w_t.astype(jnp.bfloat16),
            preferred_element_type=jnp.float32,
        ).reshape(batch, seq, hidden_d)
        + b
    )

    # --- eval mode, f32 operands (strict correctness check) ---
    y32 = vit_output_forward(x, w_t, b, training=False, compute_dtype=None)
    jax.block_until_ready(y32)
    assert y32.shape == (batch, seq, hidden_d)
    assert jnp.allclose(y32, y_ref_f32, atol=1e-4, rtol=1e-4), "f32 eval mismatch vs reference"

    # --- eval mode, bf16 operands (production path) ---
    y = vit_output_forward(x, w_t, b, training=False)
    jax.block_until_ready(y)
    assert y.shape == (batch, seq, hidden_d)
    assert jnp.allclose(y, y_ref_bf16, atol=2e-2, rtol=2e-2), "bf16 eval mismatch vs reference"

    # --- training mode (in-kernel dropout, per-element hashed mask) ---
    y_train = vit_output_forward(x, w_t, b, training=True, seed=1234)
    jax.block_until_ready(y_train)
    assert y_train.shape == (batch, seq, hidden_d)
    kept = y_train != 0.0
    # Kept elements must equal reference / (1 - p); dropped elements are exactly 0.
    assert jnp.allclose(
        jnp.where(kept, y_train * (1.0 - P_DROP), 0.0),
        jnp.where(kept, y_ref_bf16, 0.0),
        atol=2e-2,
        rtol=2e-2,
    ), "training mismatch on kept elements"
    drop_frac = float(1.0 - jnp.mean(kept.astype(jnp.float32)))
    assert 0.0 < drop_frac < 0.35, f"dropout rate looks wrong: {drop_frac}"

    print("KERNEL_OK")
</pallas_src>

<mosaic_0001>
module attributes {stable_mosaic.version = 11 : i64} {
  func.func @_dense_kernel(%arg0: i32, %arg1: memref<8x128xf32, #tpu.memory_space<vmem>>, %arg2: memref<128x128xf32, #tpu.memory_space<vmem>>, %arg3: memref<1x128xf32, #tpu.memory_space<vmem>>, %arg4: memref<8x128xf32, #tpu.memory_space<vmem>>) attributes {dimension_semantics = [#tpu.dimension_semantics<parallel>], iteration_bounds = array<i64: 2>, scalar_prefetch = 0 : i64, scratch_operands = 0 : i64, tpu.core_type = #tpu.core_type<tc>, window_params = [{transform_indices = @transform_0, window_bounds = array<i64: 8, 128>}, {pipeline_mode = #tpu.pipeline_mode<synchronous>, transform_indices = @transform_1, window_bounds = array<i64: 128, 128>}, {pipeline_mode = #tpu.pipeline_mode<synchronous>, transform_indices = @transform_2, window_bounds = array<i64: 1, 128>}, {transform_indices = @transform_3, window_bounds = array<i64: 8, 128>}]} {
    %c0 = arith.constant 0 : index
    %c0_0 = arith.constant 0 : index
    %0 = vector.load %arg1[%c0, %c0_0] : memref<8x128xf32, #tpu.memory_space<vmem>>, vector<8x128xf32>
    %c0_1 = arith.constant 0 : index
    %c0_2 = arith.constant 0 : index
    %1 = vector.load %arg2[%c0_1, %c0_2] : memref<128x128xf32, #tpu.memory_space<vmem>>, vector<128x128xf32>
    %cst = arith.constant dense<0.000000e+00> : vector<8x128xf32>
    %2 = tpu.matmul %0, %1, %cst {dimension_numbers = #tpu.dot_dimension_numbers<[1], [0], [0], [1], [0, 0, 1, 1], [], []>} : vector<8x128xf32>, vector<128x128xf32>, vector<8x128xf32> -> vector<8x128xf32>
    %c0_3 = arith.constant 0 : index
    %c0_4 = arith.constant 0 : index
    %3 = vector.load %arg3[%c0_3, %c0_4] : memref<1x128xf32, #tpu.memory_space<vmem>>, vector<1x128xf32>
    %4 = vector.broadcast %3 : vector<1x128xf32> to vector<8x128xf32>
    %5 = arith.addf %2, %4 : vector<8x128xf32>
    %c0_5 = arith.constant 0 : index
    %c0_6 = arith.constant 0 : index
    %6 = vector.load %arg4[%c0_5, %c0_6] : memref<8x128xf32, #tpu.memory_space<vmem>>, vector<8x128xf32>
    tpu.vector_store %arg4[%c0_5, %c0_6], %5 {strides = array<i32>} : memref<8x128xf32, #tpu.memory_space<vmem>>, vector<8x128xf32>,
    return
  }
  func.func @transform_0(%arg0: i32) -> (i32, i32) {
    %c0_i32 = arith.constant 0 : i32
    %c0_i32_0 = arith.constant 0 : i32
    return %arg0, %c0_i32 : i32, i32
  }
  func.func @transform_1(%arg0: i32) -> (i32, i32) {
    %c0_i32 = arith.constant 0 : i32
    %c0_i32_0 = arith.constant 0 : i32
    %c0_i32_1 = arith.constant 0 : i32
    return %c0_i32, %c0_i32_0 : i32, i32
  }
  func.func @transform_2(%arg0: i32) -> (i32, i32) {
    %c0_i32 = arith.constant 0 : i32
    %c0_i32_0 = arith.constant 0 : i32
    %c0_i32_1 = arith.constant 0 : i32
    return %c0_i32, %c0_i32_0 : i32, i32
  }
  func.func @transform_3(%arg0: i32) -> (i32, i32) {
    %c0_i32 = arith.constant 0 : i32
    %c0_i32_0 = arith.constant 0 : i32
    return %arg0, %c0_i32 : i32, i32
  }
}

</mosaic_0001>

<bundles_post_ra>
// kernel: tpu_custom_call.1
= control target key start
LH: loop header
LB: loop body
LE: loop exit
PB: predicated region body
PF: predicated region fallthrough
CT: control target
= control target key end

     0   :  { %8 = vsyncpa [#allocation3], 0  ;;  %s839_s0 = inlined_call_operand.hbm [shape: f32[16,128], index: 0, kind: input, shape index: {}]   ;;  %s840_s1 = inlined_call_operand.hbm [shape: f32[128,128], index: 1, kind: input, shape index: {}]   ;;  %s841_s2 = inlined_call_operand.vmem [shape: f32[1,128], index: 2, kind: input, shape index: {}]   ;;  %s842_s3 = inlined_call_operand.hbm [shape: f32[16,128], index: 3, kind: output, shape index: {}]  }
   0x1   :  { %10 = vsyncpa [#allocation3 + $0x1], 0 }
   0x2   :  { %11 = vsyncpa [#allocation6], 0 }
   0x3   :  { %12 = vsyncpa [#allocation4], 0 }
   0x4   :  { %14 = vsyncpa [#allocation4 + $0x1], 0  ;;  %s669_s12 = smov 0   ;;  %s671_s13 = smov 0  }
   0x5   :  { %s673_s14 = smov 0   ;;  %s675_s15 = smov 0  }
   0x6 LB: > { %s690_s16 = sadd.s32 4294967295, %s640_s15   ;;  %s390_s17 = sadd.s32 4294967294, %s640_s15   ;;  %s640_s15 = sphi %s675_s15, %s864_s15   ;;  %s636_s14 = sphi %s673_s14, %s863_s14   ;;  %s632_s13 = sphi %s671_s13, %s862_s13   ;;  %s628_s12 = sphi %s669_s12, %s861_s12  }
   0x7   : > { %p40_p0 = scmp.ne.s32.totalorder %s632_s13, %s628_s12  ;;  %p843_p1 = scmp.eq.s32.totalorder %s690_s16, 0 }
   0x8   : > { %p112_p3 = scmp.eq.s32.totalorder %s390_s17, 1  ;;  %p391_p5 = scmp.ge.s32.totalorder %s640_s15, 1 }
   0x9   : > { %p699_p4 = por %p843_p1, %p40_p0  ;;  %p119_p7 = scmp.lt.s32.totalorder %s640_s15, 3 }
   0xa   : > { %p704_p6 = por %p112_p3, %p40_p0  ;;  %s642_s21 = smov [#allocation5]  }
   0xb   : > { %s847_s18 = scalar_select %p699_p4, 1, 0 }
   0xc   : > { %s848_s19 = scalar_select %p704_p6, 1, 0 }
   0xd   : > { %p709_p8 = pnand %p391_p5, %p119_p7  ;;  %s131_s22 = sshll.u32 %s642_s21, 4  ;;  %s132_s22 = int_to_ptr.vmem [resolvable:$true] %s131_s22 }
   0xe   : > { %s723_s24 = sadd.s32 1, %s640_s15   ;;  %s27_s25 = sadd.s32 1, %s636_s14 }
   0xf   : > { %s849_s20 = scalar_select %p709_p8, 1, 0 }
  0x10   : > { %p465_p9 = pneg %p709_p8  ;;  %s24_s26 = ssub.s32 %s640_s15, %s723_s24 }
  0x11   : > { %s529_s27 = scalar_lea.vmem %s132_s22, 2048  ;;  %p537_p5 = scmp.lt.s32.totalorder %s132_s22, %s132_s22 }
  0x12   : > { %p718_p11 = pnand %p465_p9, %p843_p1  ;;  %p530_p13 = scmp.ne.s32.totalorder %s132_s22, %s529_s27 }
  0x13   : > { %p538_p7 = scmp.lt.s32.totalorder %s529_s27, %s529_s27 }
  0x14   : > { %p520_p12 = pneg %p718_p11 }
  0x15   : > { %p539_p10 = por %p538_p7, %p537_p5 }
  0x16   : > { %p532_p0 = pnand %p530_p13, %p520_p12 }
  0x18   : > { %p533_p3 = pneg %p532_p0 }
  0x1a   : > { %p540_p2 = pnand %p539_p10, %p533_p3 }
  0x1c   : > { %543 = shalt.err (!%p540_p2)
}
  0x1d   : > { %s643_s28 = smov 128   ;;  %s644_s29 = smov 8  }
  0x1e   : > { %468 = dma.hbm_to_vmem [thread:$0]  (!%p718_p11), %s840_s1, 2048, %s132_s22, [#allocation6], %s643_s28, %s643_s28, %s644_s29  }
  0x1f   : > { %p25_p9 = scmp.eq.s32.totalorder %s24_s26, 0  ;;  %p34_p12 = scmp.ne.s32.totalorder %s636_s14, %s632_s13 }
  0x20   : > { %p35_p10 = scmp.eq.s32.totalorder %s640_s15, 0  ;;  %p478_p2 = scmp.lt.s32.totalorder %s640_s15, 2 }
  0x21   : > { %s740_s5 = scalar_select %p25_p9, %s636_s14, %s27_s25  }
  0x22   : > { %p36_p13 = por %p35_p10, %p34_p12  ;;  %p851_p0 = scmp.eq.s32.totalorder %s690_s16, 1 }
  0x23   : > { %s148_s7 = sand.u32 1, %s636_s14   ;;  %s395_s8 = sshll.u32 %s640_s15, 7 }
  0x24   : > { %p744_p3 = por %p851_p0, %p34_p12  ;;  %s394_s9 = sshll.u32 %s148_s7, 3 }
  0x25   : > { %s753_s17 = scalar_lea.hbm %s839_s0, %s395_s8  ;;  %s152_s21 = scalar_lea.vmem [#allocation2], %s394_s9 }
  0x26   : > { %s852_s6 = scalar_select %p744_p3, 1, 0 }
  0x27   : > { %s159_s22 = sshll.u32 %s152_s21, 4  ;;  %p755_p11 = pnand %p478_p2, %p36_p13  ;;  %s160_s22 = int_to_ptr.vmem [resolvable:$true] %s159_s22 }
  0x28   : > { %s149_s25 = scalar_lea.sflag [#allocation3], %s148_s7  ;;  %s544_s26 = scalar_lea.hbm %s753_s17, 128 }
  0x29   : > { %p545_p5 = scmp.ne.s32.totalorder %s753_s17, %s544_s26  ;;  %p546_p7 = pneg %p755_p11 }
  0x2a   : > { %s549_s29 = scalar_lea.hbm %s839_s0, 256  ;;  %p550_p10 = scmp.lt.s32.totalorder %s753_s17, %s839_s0 }
  0x2b   : > { %p547_p9 = pnand %p546_p7, %p545_p5  ;;  %p551_p2 = scmp.lt.s32.totalorder %s549_s29, %s544_s26 }
  0x2d   : > { %p548_p12 = pneg %p547_p9  ;;  %p552_p13 = por %p551_p2, %p550_p10 }
  0x2f   : > { %p553_p0 = pnand %p552_p13, %p548_p12 }
  0x31   : > { %556 = shalt.err (!%p553_p0)
}
  0x32   : > { %s557_s8 = scalar_lea.vmem %s160_s22, 128  ;;  %s645_s7 = smov [#allocation2]  }
  0x33   : > { %p558_p1 = scmp.ne.s32.totalorder %s160_s22, %s557_s8  ;;  %s562_s9 = sshll.u32 %s645_s7, 4  ;;  %s563_s9 = int_to_ptr.vmem [resolvable:$false] %s562_s9 }
  0x34   : > { %s564_s10 = scalar_lea.vmem %s563_s9, 256  ;;  %p565_p5 = scmp.lt.s32.totalorder %s160_s22, %s563_s9 }
  0x35   : > { %p560_p6 = pnand %p558_p1, %p546_p7  ;;  %p566_p9 = scmp.lt.s32.totalorder %s564_s10, %s557_s8 }
  0x37   : > { %p561_p3 = pneg %p560_p6  ;;  %p567_p4 = por %p566_p9, %p565_p5 }
  0x39   : > { %p568_p8 = pnand %p567_p4, %p561_p3 }
  0x3b   : > { %571 = shalt.err (!%p568_p8)
}
  0x3c   : > { %472 = dma.hbm_to_vmem [thread:$0]  (!%p755_p11), %s753_s17, 128, %s160_s22, %s149_s25  }
  0x3d   : > { %p854_p12 = scmp.ne.s32.totalorder %s849_s20, 0 }
  0x3e   : > { %s776_s11 = sand.u32 (!%p854_p12), 1, %s632_s13   ;;  %p855_p1 = scmp.ne.s32.totalorder (!%p854_p12), %s847_s18, 0 }
  0x3f   : > { %168 = sbr.rel (%p854_p12) target bundleno = 313 (0x139), region = 32  ;;  %s397_s21 = sshll.u32 (!%p854_p12), %s776_s11, 3 }
  0x40   : > { %s171_s26 = scalar_lea.sflag (!%p854_p12), [#allocation3], %s776_s11  ;;  %s782_s27 = scalar_lea.vmem (!%p854_p12), [#allocation2], %s397_s21 }
  0x44   : > { %615 = dma.done.wait (%p855_p1), %s171_s26, 128  }
  0x45   : > { %617 = vsyncadd (%p855_p1), %s171_s26, 4294967168  ;;  %p856_p4 = scmp.eq.s32.totalorder %s690_s16, 0 }
  0x47   : > { %619 = dma.done.wait (%p856_p4), [#allocation6], 2048   ;;  %p857_p6 = pmov %p856_p4 }
  0x48   : > { %v646_v0 = vmov 0.0   ;;  %vm647_vm0 = vmmov 0   ;;  %v217_v1 = vld [vmem:[#allocation5 + $0x78] sm:$0xff]  ;;  %v216_v2 = vld [vmem:[#allocation5 + $0x70] sm:$0xff]  ;;  %v215_v3 = vld [vmem:[#allocation5 + $0x68] sm:$0xff]  ;;  %s402_s17 = sshll.u32 %s690_s16, 7 }
  0x49   : > { %621 = vsyncadd (%p857_p6), [#allocation6], 4294965248  ;;  %422 = vmatprep.subr.mxu0 %v646_v0  ;;  %454 = vmatprep.mubr.msk.f32.mxu0 %vm647_vm0, %v646_v0  ;;  %v214_v4 = vld [vmem:[#allocation5 + $0x60] sm:$0xff]  ;;  %v213_v5 = vld [vmem:[#allocation5 + $0x58] sm:$0xff]  ;;  %s200_s22 = scalar_lea.vmem [#allocation7], %s397_s21  ;;  %s802_s29 = scalar_lea.hbm %s842_s3, %s402_s17 }
  0x4a   : > { %423 = vmatpush3.msra.mxu0 %v217_v1  ;;  %v212_v6 = vld [vmem:[#allocation5 + $0x50] sm:$0xff]  ;;  %v211_v7 = vld [vmem:[#allocation5 + $0x48] sm:$0xff]  ;;  %v210_v8 = vld [vmem:[#allocation5 + $0x40] sm:$0xff]  ;;  %s310_s23 = sshll.u32 %s200_s22, 4  ;;  %s297_s30 = scalar_lea.sflag [#allocation4], %s776_s11  ;;  %s311_s23 = int_to_ptr.vmem [resolvable:$true] %s310_s23 }
  0x4b   : > { %424 = vmatprep.subr.mxu0 %v646_v0  ;;  %v209_v9 = vld [vmem:[#allocation5 + $0x38] sm:$0xff]  ;;  %v208_v10 = vld [vmem:[#allocation5 + $0x30] sm:$0xff]  ;;  %v207_v11 = vld [vmem:[#allocation5 + $0x28] sm:$0xff]  ;;  %s572_s4 = scalar_lea.vmem %s311_s23, 128  ;;  %p858_p3 = scmp.ne.s32.totalorder %s852_s6, 0 }
  0x4c   : > { %425 = vmatpush3.msra.mxu0 %v216_v2  ;;  %v206_v12 = vld [vmem:[#allocation5 + $0x20] sm:$0xff]  ;;  %v205_v13 = vld [vmem:[#allocation5 + $0x18] sm:$0xff]  ;;  %v204_v14 = vld [vmem:[#allocation5 + $0x10] sm:$0xff]  ;;  %p573_p8 = scmp.ne.s32.totalorder %s311_s23, %s572_s4  ;;  %s648_s16 = smov [#allocation7]  }
  0x4d   : > { %426 = vmatprep.subr.mxu0 %v646_v0  ;;  %v203_v15 = vld [vmem:[#allocation5 + $0x8] sm:$0xff]  ;;  %v202_v16 = vld [vmem:[#allocation5] sm:$0xff]  ;;  %v201_v17 = vld [vmem:[%s782_s27] sm:$0xff]  ;;  %s576_s8 = sshll.u32 %s648_s16, 4  ;;  %s577_s8 = int_to_ptr.vmem [resolvable:$false] %s576_s8 }
  0x4e   : > { %427 = vmatpush3.msra.mxu0 %v215_v3  ;;  %v400_v18 = vld [vmem:[%s841_s2] ss:$0 sm:$0xff]  ;;  %p574_p11 = pnand %p573_p8, %p858_p3  ;;  %s578_s7 = scalar_lea.vmem %s577_s8, 256 }
  0x4f   : > { %428 = vmatprep.subr.mxu0 %v646_v0  ;;  %p579_p10 = scmp.lt.s32.totalorder %s311_s23, %s577_s8  ;;  %p580_p2 = scmp.lt.s32.totalorder %s578_s7, %s572_s4 }
  0x50   : > { %429 = vmatpush3.msra.mxu0 %v214_v4  ;;  %p575_p7 = pneg %p574_p11 }
  0x51   : > { %430 = vmatprep.subr.mxu0 %v646_v0  ;;  %p581_p13 = por %p580_p2, %p579_p10 }
  0x52   : > { %431 = vmatpush3.msra.mxu0 %v213_v5 }
  0x53   : > { %432 = vmatprep.subr.mxu0 %v646_v0  ;;  %p582_p0 = pnand %p581_p13, %p575_p7 }
  0x54   : > { %433 = vmatpush3.msra.mxu0 %v212_v6 }
  0x55   : > { %434 = vmatprep.subr.mxu0 %v646_v0 }
  0x56   : > { %435 = vmatpush3.msra.mxu0 %v211_v7 }
  0x57   : > { %436 = vmatprep.subr.mxu0 %v646_v0 }
  0x58   : > { %437 = vmatpush3.msra.mxu0 %v210_v8 }
  0x59   : > { %438 = vmatprep.subr.mxu0 %v646_v0 }
  0x5a   : > { %439 = vmatpush3.msra.mxu0 %v209_v9 }
  0x5b   : > { %440 = vmatprep.subr.mxu0 %v646_v0 }
  0x5c   : > { %441 = vmatpush3.msra.mxu0 %v208_v10 }
  0x5d   : > { %442 = vmatprep.subr.mxu0 %v646_v0 }
  0x5e   : > { %443 = vmatpush3.msra.mxu0 %v207_v11 }
  0x5f   : > { %444 = vmatprep.subr.mxu0 %v646_v0 }
  0x60   : > { %445 = vmatpush3.msra.mxu0 %v206_v12 }
  0x61   : > { %446 = vmatprep.subr.mxu0 %v646_v0 }
  0x62   : > { %447 = vmatpush3.msra.mxu0 %v205_v13 }
  0x63   : > { %448 = vmatprep.subr.mxu0 %v646_v0 }
  0x64   : > { %449 = vmatpush3.msra.mxu0 %v204_v14 }
  0x65   : > { %450 = vmatprep.subr.mxu0 %v646_v0 }
  0x66   : > { %451 = vmatpush3.msra.mxu0 %v203_v15 }
  0x67   : > { %452 = vmatprep.subr.mxu0 %v646_v0 }
  0x68   : > { %453 = vmatpush3.msra.mxu0 %v202_v16 }
  0x69   : > { %455 = vmatmul.mubr.f32.vlgmr.msra.gmra.mxu0 %v201_v17 }
 0x129   : > { %v291_v19 = vpop.f32.mrf.mxu0 }
 0x12a   : > { %v292_v20 = vadd.f32 %v400_v18, %v291_v19 }
 0x12b   : > { %v456_v21 = vpop.f32.mrf.mxu0 }
 0x12c   : > { %295 = vst [vmem:[%s200_s22] sm:$0xff] %v292_v20 }
 0x12d   : > { %585 = shalt.err (!%p582_p0)
}
 0x12e   : > { %s586_s9 = scalar_lea.hbm %s802_s29, 128  ;;  %s590_s21 = scalar_lea.hbm %s842_s3, 256 }
 0x12f   : > { %p587_p5 = scmp.ne.s32.totalorder %s802_s29, %s586_s9  ;;  %p591_p1 = scmp.lt.s32.totalorder %s802_s29, %s842_s3 }
 0x130   : > { %p592_p4 = scmp.lt.s32.totalorder %s590_s21, %s586_s9 }
 0x131   : > { %p588_p9 = pnand %p587_p5, %p858_p3 }
 0x132   : > { %p593_p6 = por %p592_p4, %p591_p1 }
 0x133   : > { %p589_p12 = pneg %p588_p9 }
 0x135   : > { %p594_p8 = pnand %p593_p6, %p589_p12 }
 0x137   : > { %597 = shalt.err (!%p594_p8)
}
 0x138   : > { %463 = dma.vmem_to_hbm [thread:$0]  (%p858_p3), %s311_s23, 128, %s802_s29, %s297_s30  }
 0x139 PF: > { %s322_s18 = sand.u32 1, %s628_s12   ;;  %p859_p11 = scmp.ne.s32.totalorder %s848_s19, 0 }
 0x13a   : > { %p860_p7 = scmp.ge.s32.totalorder %s640_s15, 2  ;;  %s323_s20 = scalar_lea.sflag [#allocation4], %s322_s18 }
 0x13c   : > { %p474_p10 = pnand %p860_p7, %p859_p11 }
 0x13e   : > { %p475_p2 = pneg %p474_p10 }
 0x140   : > { %623 = dma.done.wait (%p475_p2), %s323_s20, 128  }
 0x141   : > { %625 = vsyncadd (%p475_p2), %s323_s20, 4294967168  ;;  %p17_p13 = scmp.ge.s32.totalorder %s723_s24, 4   ;;  %s861_s12 = smov %s632_s13 }
 0x142   : > { %s862_s13 = smov %s636_s14  ;;  %s863_s14 = smov %s740_s5 }
 0x143   : > { %s864_s15 = smov %s723_s24  ;;  %19 = sbr.rel (!%p17_p13) target bundleno = 6 (0x6), region = 81 }
 0x148   :  { %328 = vsyncpa [#allocation3], 1 }
 0x149   :  { %330 = vsyncpa [#allocation3 + $0x1], 1 }
 0x14a   :  { %331 = vsyncpa [#allocation6], 1 }
 0x14b   :  { %332 = vsyncpa [#allocation4], 1 }
 0x14c   :  { %334 = vsyncpa [#allocation4 + $0x1], 1 }

</bundles_post_ra>
